<compile_context>
chip_gen: v7x
topology: tpu7x:2x2x1
jax: 0.10.0
libtpu: 0.0.40
codegen_flags: <defaults>
</compile_context>

<pallas_src>
import jax
import jax.numpy as jnp
from jax.experimental import pallas as pl
from jax.experimental.pallas import tpu as pltpu

EPS = 1e-5
LANE = 128


def _round_up(x, m):
    return ((x + m - 1) // m) * m


def _pad2d(a, rows, cols):
    return jnp.pad(a, ((0, rows - a.shape[0]), (0, cols - a.shape[1])))


def mlp_kernel(x_ref,
               w1_ref, b1_ref,
               w2_ref, b2_ref,
               w3_ref, b3_ref,
               s3_ref, t3_ref,
               o_ref):
    # BN0/BN1/BN2 are pre-folded into W/b; only the final BN affine remains.
    x = x_ref[...]
    h1 = jnp.maximum(
        jnp.dot(x, w1_ref[...], preferred_element_type=jnp.float32) + b1_ref[...], 0.0)
    h2 = jnp.maximum(
        jnp.dot(h1, w2_ref[...], preferred_element_type=jnp.float32) + b2_ref[...], 0.0)
    h3 = jnp.maximum(
        jnp.dot(h2, w3_ref[...], preferred_element_type=jnp.float32) + b3_ref[...], 0.0)
    o_ref[...] = h3 * s3_ref[...] + t3_ref[...]


def fold_bn(gamma, beta, running_mean, running_var):
    scale = gamma / jnp.sqrt(running_var + EPS)
    shift = beta - running_mean * scale
    return scale.astype(jnp.float32), shift.astype(jnp.float32)


def pytorch_nn_forward(x, params, *, max_batch_tile=512):
    """x: [batch, input_dim] float32. params: dict of Linear weights / BN stats."""
    batch, input_dim = x.shape
    hidden1 = params["w1"].shape[0]
    hidden2 = params["w2"].shape[0]
    output_dim = params["w3"].shape[0]

    # ---- fold the BatchNorms ----------------------------------------------------------
    s0, t0 = fold_bn(params["bn0_g"], params["bn0_b"], params["bn0_m"], params["bn0_v"])
    s1, t1 = fold_bn(params["bn1_g"], params["bn1_b"], params["bn1_m"], params["bn1_v"])
    s2, t2 = fold_bn(params["bn2_g"], params["bn2_b"], params["bn2_m"], params["bn2_v"])
    s3, t3 = fold_bn(params["bn3_g"], params["bn3_b"], params["bn3_m"], params["bn3_v"])

    # PyTorch Linear weight is [out, in]; transpose to [in, out] for x @ W.
    w1t = params["w1"].T.astype(jnp.float32)
    w2t = params["w2"].T.astype(jnp.float32)
    w3t = params["w3"].T.astype(jnp.float32)

    # BN0 -> W1/b1 ;  BN1 -> W2/b2 ;  BN2 -> W3/b3  (BN is post-ReLU, so its affine
    # commutes into the *next* Linear).
    w1f = s0[:, None] * w1t
    b1f = t0 @ w1t + params["b1"].astype(jnp.float32)
    w2f = s1[:, None] * w2t
    b2f = t1 @ w2t + params["b2"].astype(jnp.float32)
    w3f = s2[:, None] * w3t
    b3f = t2 @ w3t + params["b3"].astype(jnp.float32)

    # ---- pad feature dims to lane width (128) so stores / MXU N-dims are dense --------
    H1P = _round_up(hidden1, LANE)
    H2P = _round_up(hidden2, LANE)
    DOP = _round_up(output_dim, LANE)

    w1p = _pad2d(w1f, input_dim, H1P)
    b1p = _pad2d(b1f[None, :], 1, H1P)
    w2p = _pad2d(w2f, H1P, H2P)
    b2p = _pad2d(b2f[None, :], 1, H2P)
    w3p = _pad2d(w3f, H2P, DOP)
    b3p = _pad2d(b3f[None, :], 1, DOP)
    s3p = _pad2d(s3[None, :], 1, DOP)
    t3p = _pad2d(t3[None, :], 1, DOP)

    # ---- batch tiling ------------------------------------------------------------------
    if batch <= max_batch_tile:
        tb = _round_up(batch, 8)
    else:
        tb = max_batch_tile
    batch_pad = _round_up(batch, tb)
    xp = jnp.pad(x.astype(jnp.float32), ((0, batch_pad - batch), (0, 0)))
    grid = (batch_pad // tb,)

    const = lambda i: (0, 0)   # weights / final-BN terms: VMEM-resident across grid steps
    in_specs = [
        pl.BlockSpec((tb, input_dim), lambda i: (i, 0)),   # streamed activation tile
        pl.BlockSpec((input_dim, H1P), const),
        pl.BlockSpec((1, H1P), const),
        pl.BlockSpec((H1P, H2P), const),
        pl.BlockSpec((1, H2P), const),
        pl.BlockSpec((H2P, DOP), const),
        pl.BlockSpec((1, DOP), const),
        pl.BlockSpec((1, DOP), const),
        pl.BlockSpec((1, DOP), const),
    ]
    out_specs = pl.BlockSpec((tb, DOP), lambda i: (i, 0))

    # ---- VMEM budget / cost estimate ---------------------------------------------------
    f32 = 4
    weight_bytes = f32 * (input_dim * H1P + H1P * H2P + H2P * DOP + 4 * DOP + H1P + H2P)
    act_tile_bytes = f32 * tb * (input_dim + DOP)
    interm_bytes = f32 * tb * (H1P + H2P + DOP)
    needed = 2 * act_tile_bytes + 2 * weight_bytes + interm_bytes
    vmem_limit = min(max(2 * needed, 16 * 1024 * 1024), 48 * 1024 * 1024)

    flops = 2 * batch_pad * (input_dim * H1P + H1P * H2P + H2P * DOP)
    bytes_accessed = f32 * batch_pad * (input_dim + DOP) + weight_bytes
    cost = pl.CostEstimate(flops=flops, transcendentals=0, bytes_accessed=bytes_accessed)

    out = pl.pallas_call(
        mlp_kernel,
        out_shape=jax.ShapeDtypeStruct((batch_pad, DOP), jnp.float32),
        grid=grid,
        in_specs=in_specs,
        out_specs=out_specs,
        compiler_params=pltpu.CompilerParams(
            dimension_semantics=("parallel",),
            vmem_limit_bytes=vmem_limit,
        ),
        cost_estimate=cost,
    )(xp, w1p, b1p, w2p, b2p, w3p, b3p, s3p, t3p)

    return out[:batch, :output_dim]


def reference_forward(x, params):
    """Pure-JAX reference matching PyTorch eval-mode semantics."""
    def bn(h, g, b, m, v):
        return (h - m) / jnp.sqrt(v + EPS) * g + b

    y = bn(x, params["bn0_g"], params["bn0_b"], params["bn0_m"], params["bn0_v"])
    y = jnp.maximum(y @ params["w1"].T + params["b1"], 0.0)
    y = bn(y, params["bn1_g"], params["bn1_b"], params["bn1_m"], params["bn1_v"])
    y = jnp.maximum(y @ params["w2"].T + params["b2"], 0.0)
    y = bn(y, params["bn2_g"], params["bn2_b"], params["bn2_m"], params["bn2_v"])
    y = jnp.maximum(y @ params["w3"].T + params["b3"], 0.0)
    y = bn(y, params["bn3_g"], params["bn3_b"], params["bn3_m"], params["bn3_v"])
    return y


def init_params(key, input_dim, hidden1, hidden2, output_dim):
    keys = jax.random.split(key, 16)

    def linear(kw, kb, out_d, in_d):
        bound = 1.0 / jnp.sqrt(in_d)
        w = jax.random.uniform(kw, (out_d, in_d), jnp.float32, -bound, bound)
        b = jax.random.uniform(kb, (out_d,), jnp.float32, -bound, bound)
        return w, b

    def bn_stats(km, kv, dim):
        m = jax.random.normal(km, (dim,), jnp.float32) * 0.1
        v = jax.random.uniform(kv, (dim,), jnp.float32, 0.5, 1.5)
        g = jnp.ones((dim,), jnp.float32)
        b = jnp.zeros((dim,), jnp.float32)
        return g, b, m, v

    p = {}
    p["w1"], p["b1"] = linear(keys[0], keys[1], hidden1, input_dim)
    p["w2"], p["b2"] = linear(keys[2], keys[3], hidden2, hidden1)
    p["w3"], p["b3"] = linear(keys[4], keys[5], output_dim, hidden2)
    p["bn0_g"], p["bn0_b"], p["bn0_m"], p["bn0_v"] = bn_stats(keys[6], keys[7], input_dim)
    p["bn1_g"], p["bn1_b"], p["bn1_m"], p["bn1_v"] = bn_stats(keys[8], keys[9], hidden1)
    p["bn2_g"], p["bn2_b"], p["bn2_m"], p["bn2_v"] = bn_stats(keys[10], keys[11], hidden2)
    p["bn3_g"], p["bn3_b"], p["bn3_m"], p["bn3_v"] = bn_stats(keys[12], keys[13], output_dim)
    return p


if __name__ == "__main__":
    # Small shapes consistent with the module's forward: [batch, input_dim] features.
    batch, input_dim, hidden1, hidden2, output_dim = 8, 32, 64, 32, 16
    drp_rate = 0.2  # dropout is identity in eval-mode forward; no RNG mask applied.

    key = jax.random.PRNGKey(0)
    k_x, k_p = jax.random.split(key)
    x = jax.random.normal(k_x, (batch, input_dim), jnp.float32)
    params = init_params(k_p, input_dim, hidden1, hidden2, output_dim)

    out = pytorch_nn_forward(x, params)
    out = jax.block_until_ready(out)

    ref = reference_forward(x, params)
    assert out.shape == (batch, output_dim)
    assert jnp.allclose(out, ref, atol=1e-4, rtol=1e-4), "Pallas output mismatch vs reference"

    print("KERNEL_OK")
</pallas_src>

<mosaic_0001>
module attributes {stable_mosaic.version = 11 : i64} {
  func.func @mlp_kernel(%arg0: i32, %arg1: memref<8x32xf32, #tpu.memory_space<vmem>>, %arg2: memref<32x128xf32, #tpu.memory_space<vmem>>, %arg3: memref<1x128xf32, #tpu.memory_space<vmem>>, %arg4: memref<128x128xf32, #tpu.memory_space<vmem>>, %arg5: memref<1x128xf32, #tpu.memory_space<vmem>>, %arg6: memref<128x128xf32, #tpu.memory_space<vmem>>, %arg7: memref<1x128xf32, #tpu.memory_space<vmem>>, %arg8: memref<1x128xf32, #tpu.memory_space<vmem>>, %arg9: memref<1x128xf32, #tpu.memory_space<vmem>>, %arg10: memref<8x128xf32, #tpu.memory_space<vmem>>) attributes {dimension_semantics = [#tpu.dimension_semantics<parallel>], iteration_bounds = array<i64: 1>, scalar_prefetch = 0 : i64, scratch_operands = 0 : i64, tpu.core_type = #tpu.core_type<tc>, window_params = [{transform_indices = @transform_0, window_bounds = array<i64: 8, 32>}, {pipeline_mode = #tpu.pipeline_mode<synchronous>, transform_indices = @transform_1, window_bounds = array<i64: 32, 128>}, {pipeline_mode = #tpu.pipeline_mode<synchronous>, transform_indices = @transform_2, window_bounds = array<i64: 1, 128>}, {pipeline_mode = #tpu.pipeline_mode<synchronous>, transform_indices = @transform_3, window_bounds = array<i64: 128, 128>}, {pipeline_mode = #tpu.pipeline_mode<synchronous>, transform_indices = @transform_4, window_bounds = array<i64: 1, 128>}, {pipeline_mode = #tpu.pipeline_mode<synchronous>, transform_indices = @transform_5, window_bounds = array<i64: 128, 128>}, {pipeline_mode = #tpu.pipeline_mode<synchronous>, transform_indices = @transform_6, window_bounds = array<i64: 1, 128>}, {pipeline_mode = #tpu.pipeline_mode<synchronous>, transform_indices = @transform_7, window_bounds = array<i64: 1, 128>}, {pipeline_mode = #tpu.pipeline_mode<synchronous>, transform_indices = @transform_8, window_bounds = array<i64: 1, 128>}, {transform_indices = @transform_9, window_bounds = array<i64: 8, 128>}]} {
    %c0 = arith.constant 0 : index
    %c0_0 = arith.constant 0 : index
    %0 = vector.load %arg1[%c0, %c0_0] : memref<8x32xf32, #tpu.memory_space<vmem>>, vector<8x32xf32>
    %c0_1 = arith.constant 0 : index
    %c0_2 = arith.constant 0 : index
    %1 = vector.load %arg2[%c0_1, %c0_2] : memref<32x128xf32, #tpu.memory_space<vmem>>, vector<32x128xf32>
    %cst = arith.constant dense<0.000000e+00> : vector<8x128xf32>
    %2 = tpu.matmul %0, %1, %cst {dimension_numbers = #tpu.dot_dimension_numbers<[1], [0], [0], [1], [0, 0, 1, 1], [], []>} : vector<8x32xf32>, vector<32x128xf32>, vector<8x128xf32> -> vector<8x128xf32>
    %c0_3 = arith.constant 0 : index
    %c0_4 = arith.constant 0 : index
    %3 = vector.load %arg3[%c0_3, %c0_4] : memref<1x128xf32, #tpu.memory_space<vmem>>, vector<1x128xf32>
    %4 = vector.broadcast %3 : vector<1x128xf32> to vector<8x128xf32>
    %5 = arith.addf %2, %4 : vector<8x128xf32>
    %cst_5 = arith.constant 0.000000e+00 : f32
    %6 = vector.broadcast %cst_5 : f32 to vector<8x128xf32>
    %7 = arith.maximumf %5, %6 : vector<8x128xf32>
    %c0_6 = arith.constant 0 : index
    %c0_7 = arith.constant 0 : index
    %8 = vector.load %arg4[%c0_6, %c0_7] : memref<128x128xf32, #tpu.memory_space<vmem>>, vector<128x128xf32>
    %cst_8 = arith.constant dense<0.000000e+00> : vector<8x128xf32>
    %9 = tpu.matmul %7, %8, %cst_8 {dimension_numbers = #tpu.dot_dimension_numbers<[1], [0], [0], [1], [0, 0, 1, 1], [], []>} : vector<8x128xf32>, vector<128x128xf32>, vector<8x128xf32> -> vector<8x128xf32>
    %c0_9 = arith.constant 0 : index
    %c0_10 = arith.constant 0 : index
    %10 = vector.load %arg5[%c0_9, %c0_10] : memref<1x128xf32, #tpu.memory_space<vmem>>, vector<1x128xf32>
    %11 = vector.broadcast %10 : vector<1x128xf32> to vector<8x128xf32>
    %12 = arith.addf %9, %11 : vector<8x128xf32>
    %cst_11 = arith.constant 0.000000e+00 : f32
    %13 = vector.broadcast %cst_11 : f32 to vector<8x128xf32>
    %14 = arith.maximumf %12, %13 : vector<8x128xf32>
    %c0_12 = arith.constant 0 : index
    %c0_13 = arith.constant 0 : index
    %15 = vector.load %arg6[%c0_12, %c0_13] : memref<128x128xf32, #tpu.memory_space<vmem>>, vector<128x128xf32>
    %cst_14 = arith.constant dense<0.000000e+00> : vector<8x128xf32>
    %16 = tpu.matmul %14, %15, %cst_14 {dimension_numbers = #tpu.dot_dimension_numbers<[1], [0], [0], [1], [0, 0, 1, 1], [], []>} : vector<8x128xf32>, vector<128x128xf32>, vector<8x128xf32> -> vector<8x128xf32>
    %c0_15 = arith.constant 0 : index
    %c0_16 = arith.constant 0 : index
    %17 = vector.load %arg7[%c0_15, %c0_16] : memref<1x128xf32, #tpu.memory_space<vmem>>, vector<1x128xf32>
    %18 = vector.broadcast %17 : vector<1x128xf32> to vector<8x128xf32>
    %19 = arith.addf %16, %18 : vector<8x128xf32>
    %cst_17 = arith.constant 0.000000e+00 : f32
    %20 = vector.broadcast %cst_17 : f32 to vector<8x128xf32>
    %21 = arith.maximumf %19, %20 : vector<8x128xf32>
    %c0_18 = arith.constant 0 : index
    %c0_19 = arith.constant 0 : index
    %22 = vector.load %arg8[%c0_18, %c0_19] : memref<1x128xf32, #tpu.memory_space<vmem>>, vector<1x128xf32>
    %23 = vector.broadcast %22 : vector<1x128xf32> to vector<8x128xf32>
    %24 = arith.mulf %21, %23 : vector<8x128xf32>
    %c0_20 = arith.constant 0 : index
    %c0_21 = arith.constant 0 : index
    %25 = vector.load %arg9[%c0_20, %c0_21] : memref<1x128xf32, #tpu.memory_space<vmem>>, vector<1x128xf32>
    %26 = vector.broadcast %25 : vector<1x128xf32> to vector<8x128xf32>
    %27 = arith.addf %24, %26 : vector<8x128xf32>
    %c0_22 = arith.constant 0 : index
    %c0_23 = arith.constant 0 : index
    %28 = vector.load %arg10[%c0_22, %c0_23] : memref<8x128xf32, #tpu.memory_space<vmem>>, vector<8x128xf32>
    tpu.vector_store %arg10[%c0_22, %c0_23], %27 {strides = array<i32>} : memref<8x128xf32, #tpu.memory_space<vmem>>, vector<8x128xf32>,
    return
  }
  func.func @transform_0(%arg0: i32) -> (i32, i32) {
    %c0_i32 = arith.constant 0 : i32
    %c0_i32_0 = arith.constant 0 : i32
    return %arg0, %c0_i32 : i32, i32
  }
  func.func @transform_1(%arg0: i32) -> (i32, i32) {
    %c0_i32 = arith.constant 0 : i32
    %c0_i32_0 = arith.constant 0 : i32
    %c0_i32_1 = arith.constant 0 : i32
    return %c0_i32, %c0_i32_0 : i32, i32
  }
  func.func @transform_2(%arg0: i32) -> (i32, i32) {
    %c0_i32 = arith.constant 0 : i32
    %c0_i32_0 = arith.constant 0 : i32
    %c0_i32_1 = arith.constant 0 : i32
    return %c0_i32, %c0_i32_0 : i32, i32
  }
  func.func @transform_3(%arg0: i32) -> (i32, i32) {
    %c0_i32 = arith.constant 0 : i32
    %c0_i32_0 = arith.constant 0 : i32
    %c0_i32_1 = arith.constant 0 : i32
    return %c0_i32, %c0_i32_0 : i32, i32
  }
  func.func @transform_4(%arg0: i32) -> (i32, i32) {
    %c0_i32 = arith.constant 0 : i32
    %c0_i32_0 = arith.constant 0 : i32
    %c0_i32_1 = arith.constant 0 : i32
    return %c0_i32, %c0_i32_0 : i32, i32
  }
  func.func @transform_5(%arg0: i32) -> (i32, i32) {
    %c0_i32 = arith.constant 0 : i32
    %c0_i32_0 = arith.constant 0 : i32
    %c0_i32_1 = arith.constant 0 : i32
    return %c0_i32, %c0_i32_0 : i32, i32
  }
  func.func @transform_6(%arg0: i32) -> (i32, i32) {
    %c0_i32 = arith.constant 0 : i32
    %c0_i32_0 = arith.constant 0 : i32
    %c0_i32_1 = arith.constant 0 : i32
    return %c0_i32, %c0_i32_0 : i32, i32
  }
  func.func @transform_7(%arg0: i32) -> (i32, i32) {
    %c0_i32 = arith.constant 0 : i32
    %c0_i32_0 = arith.constant 0 : i32
    %c0_i32_1 = arith.constant 0 : i32
    return %c0_i32, %c0_i32_0 : i32, i32
  }
  func.func @transform_8(%arg0: i32) -> (i32, i32) {
    %c0_i32 = arith.constant 0 : i32
    %c0_i32_0 = arith.constant 0 : i32
    %c0_i32_1 = arith.constant 0 : i32
    return %c0_i32, %c0_i32_0 : i32, i32
  }
  func.func @transform_9(%arg0: i32) -> (i32, i32) {
    %c0_i32 = arith.constant 0 : i32
    %c0_i32_0 = arith.constant 0 : i32
    return %arg0, %c0_i32 : i32, i32
  }
}

</mosaic_0001>

<bundles_post_ra>
// kernel: tpu_custom_call.1
= control target key start
LH: loop header
LB: loop body
LE: loop exit
PB: predicated region body
PF: predicated region fallthrough
CT: control target
= control target key end

     0   :  { %14 = vsyncpa [#allocation3], 0  ;;  %s868_s0 = inlined_call_operand.hbm [shape: f32[8,32], index: 0, kind: input, shape index: {}]   ;;  %s869_s1 = inlined_call_operand.hbm [shape: f32[32,128], index: 1, kind: input, shape index: {}]   ;;  %s870_s2 = inlined_call_operand.vmem [shape: f32[1,128], index: 2, kind: input, shape index: {}]   ;;  %s871_s3 = inlined_call_operand.hbm [shape: f32[128,128], index: 3, kind: input, shape index: {}]   ;;  %s872_s4 = inlined_call_operand.vmem [shape: f32[1,128], index: 4, kind: input, shape index: {}]   ;;  %s873_s5 = inlined_call_operand.hbm [shape: f32[128,128], index: 5, kind: input, shape index: {}]   ;;  %s874_s6 = inlined_call_operand.vmem [shape: f32[1,128], index: 6, kind: input, shape index: {}]   ;;  %s875_s7 = inlined_call_operand.vmem [shape: f32[1,128], index: 7, kind: input, shape index: {}]   ;;  %s876_s8 = inlined_call_operand.vmem [shape: f32[1,128], index: 8, kind: input, shape index: {}]   ;;  %s877_s9 = inlined_call_operand.hbm [shape: f32[8,128], index: 9, kind: output, shape index: {}]  }
   0x1   :  { %15 = vsyncpa [#allocation6], 0 }
   0x2   :  { %16 = vsyncpa [#allocation9], 0 }
   0x3   :  { %17 = vsyncpa [#allocation4], 0  ;;  %s703_s30 = smov [#allocation5]   ;;  %s585_s13 = scalar_lea.hbm %s869_s1, 512 }
   0x4   :  { %s33_s10 = sshll.u32 %s703_s30, 4  ;;  %p586_p0 = scmp.ne.s32.totalorder %s869_s1, %s585_s13  ;;  %s34_s10 = int_to_ptr.vmem [resolvable:$true] %s33_s10 }
   0x5   :  { %p589_p1 = scmp.lt.u32.totalorder %s585_s13, %s869_s1 }
   0x7   :  { %p591_p2 = pnand %p589_p1, %p586_p0 }
   0x9   :  { %594 = shalt.err (!%p591_p2)
}
   0xa   :  { %s595_s18 = scalar_lea.vmem %s34_s10, 512  ;;  %p600_p4 = scmp.lt.s32.totalorder %s34_s10, %s34_s10 }
   0xb   :  { %p596_p3 = scmp.ne.s32.totalorder %s34_s10, %s595_s18  ;;  %p601_p5 = scmp.lt.s32.totalorder %s595_s18, %s595_s18 }
   0xd   :  { %p602_p6 = por %p601_p5, %p600_p4 }
   0xf   :  { %p603_p7 = pnand %p602_p6, %p596_p3 }
  0x11   :  { %606 = shalt.err (!%p603_p7)
}
  0x12   :  { %s704_s19 = smov 128   ;;  %s705_s20 = smov 8  }
  0x13   :  { %39 = dma.hbm_to_vmem [thread:$0]  %s869_s1, 512, %s34_s10, [#allocation6], %s704_s19, %s704_s19, %s705_s20  }
  0x14   :  { %s706_s23 = smov [#allocation2]   ;;  %s707_s25 = smov [#allocation7]  }
  0x15   :  { %s24_s24 = sshll.u32 %s706_s23, 4  ;;  %s47_s26 = sshll.u32 %s707_s25, 4  ;;  %s25_s24 = int_to_ptr.vmem [resolvable:$true] %s24_s24  ;;  %s48_s26 = int_to_ptr.vmem [resolvable:$true] %s47_s26 }
  0x16   :  { %s607_s29 = scalar_lea.hbm %s868_s0, 128 }
  0x17   :  { %p608_p8 = scmp.ne.s32.totalorder %s868_s0, %s607_s29  ;;  %p611_p9 = scmp.lt.u32.totalorder %s607_s29, %s868_s0 }
  0x19   :  { %p613_p10 = pnand %p611_p9, %p608_p8 }
  0x1b   :  { %616 = shalt.err (!%p613_p10)
}
  0x1c   :  { %s617_s1 = scalar_lea.vmem %s25_s24, 128  ;;  %p622_p12 = scmp.lt.s32.totalorder %s25_s24, %s25_s24 }
  0x1d   :  { %p618_p11 = scmp.ne.s32.totalorder %s25_s24, %s617_s1  ;;  %p623_p13 = scmp.lt.s32.totalorder %s617_s1, %s617_s1 }
  0x1f   :  { %p624_p0 = por %p623_p13, %p622_p12 }
  0x21   :  { %p625_p1 = pnand %p624_p0, %p618_p11 }
  0x23   :  { %628 = shalt.err (!%p625_p1)
}
  0x24   :  { %27 = dma.hbm_to_vmem [thread:$0]  %s868_s0, 128, %s25_s24, [#allocation3]  }
  0x25   :  { %s629_s17 = scalar_lea.hbm %s871_s3, 2048 }
  0x26   :  { %p630_p2 = scmp.ne.s32.totalorder %s871_s3, %s629_s17  ;;  %p633_p3 = scmp.lt.u32.totalorder %s629_s17, %s871_s3 }
  0x28   :  { %p635_p4 = pnand %p633_p3, %p630_p2 }
  0x2a   :  { %638 = shalt.err (!%p635_p4)
}
  0x2b   :  { %s639_s25 = scalar_lea.vmem %s48_s26, 2048  ;;  %p644_p6 = scmp.lt.s32.totalorder %s48_s26, %s48_s26 }
  0x2c   :  { %p640_p5 = scmp.ne.s32.totalorder %s48_s26, %s639_s25  ;;  %p645_p7 = scmp.lt.s32.totalorder %s639_s25, %s639_s25 }
  0x2e   :  { %p646_p8 = por %p645_p7, %p644_p6 }
  0x30   :  { %p647_p9 = pnand %p646_p8, %p640_p5 }
  0x32   :  { %650 = shalt.err (!%p647_p9)
}
  0x33   :  { %53 = dma.hbm_to_vmem [thread:$0]  %s871_s3, 2048, %s48_s26, [#allocation6], %s704_s19, %s704_s19, %s705_s20  }
  0x34   :  { %s708_s27 = smov [#allocation8]   ;;  %s651_s11 = scalar_lea.hbm %s873_s5, 2048 }
  0x35   :  { %s61_s28 = sshll.u32 %s708_s27, 4  ;;  %p652_p10 = scmp.ne.s32.totalorder %s873_s5, %s651_s11  ;;  %s62_s28 = int_to_ptr.vmem [resolvable:$true] %s61_s28 }
  0x36   :  { %p655_p11 = scmp.lt.u32.totalorder %s651_s11, %s873_s5 }
  0x38   :  { %p657_p12 = pnand %p655_p11, %p652_p10 }
  0x3a   :  { %660 = shalt.err (!%p657_p12)
}
  0x3b   :  { %s661_s14 = scalar_lea.vmem %s62_s28, 2048  ;;  %p666_p0 = scmp.lt.s32.totalorder %s62_s28, %s62_s28 }
  0x3c   :  { %p662_p13 = scmp.ne.s32.totalorder %s62_s28, %s661_s14  ;;  %p667_p1 = scmp.lt.s32.totalorder %s661_s14, %s661_s14 }
  0x3e   :  { %p668_p2 = por %p667_p1, %p666_p0 }
  0x40   :  { %p669_p3 = pnand %p668_p2, %p662_p13 }
  0x42   :  { %672 = shalt.err (!%p669_p3)
}
  0x43   :  { %67 = dma.hbm_to_vmem [thread:$0]  %s873_s5, 2048, %s62_s28, [#allocation9], %s704_s19, %s704_s19, %s705_s20  }
  0x44   :  { %695 = dma.done.wait [#allocation3], 128  }
  0x45   :  { %696 = vsyncadd [#allocation3], 4294967168 }
  0x46   :  { %697 = dma.done.wait [#allocation6], 2560  }
  0x47   :  { %698 = vsyncadd [#allocation6], 4294964736 }
  0x48   :  { %699 = dma.done.wait [#allocation9], 2048  }
  0x49   :  { %700 = vsyncadd [#allocation9], 4294965248  ;;  %v709_v0 = vmov 0.0|0.0   ;;  %vm710_vm0 = vmmov 0   ;;  %v711_v1 = vmov 0.0   ;;  %v87_v2 = vld [vmem:[#allocation5] sm:$0xff] }
  0x4a   :  { %521 = vmatprep.subr.bf16.mxu0 %v709_v0  ;;  %448 = vmatprep.mubr.msk.f32.mxu0 %vm710_vm0, %v711_v1  ;;  %v88_v3 = vld [vmem:[#allocation5 + $0x8] sm:$0xff]  ;;  %v89_v4 = vld [vmem:[#allocation5 + $0x10] sm:$0xff]  ;;  %v90_v6 = vld [vmem:[#allocation5 + $0x18] sm:$0xff]  ;;  %vm98_vm1 = vcmask 261120  }
  0x4b   :  { %527 = vmatprep.subr.bf16.mxu1 %v709_v0  ;;  %483 = vmatprep.mubr.msk.f32.mxu1 %vm710_vm0, %v711_v1  ;;  %v522_v5 = vpack.c.bf16 %v88_v3, %v87_v2  ;;  %v173_v7 = vld [vmem:[#allocation7] sm:$0xff]  ;;  %v174_v8 = vld [vmem:[#allocation7 + $0x8] sm:$0xff]  ;;  %v175_v9 = vld [vmem:[#allocation7 + $0x10] sm:$0xff]  ;;  %v525_v11 = vpack.c.bf16 %v90_v6, %v89_v4 }
  0x4c   :  { %v176_v10 = vld [vmem:[#allocation7 + $0x18] sm:$0xff]  ;;  %v528_v12 = vpack.c.bf16 %v174_v8, %v173_v7  ;;  %v177_v14 = vld [vmem:[#allocation7 + $0x20] sm:$0xff]  ;;  %v178_v15 = vld [vmem:[#allocation7 + $0x28] sm:$0xff] }
  0x4d   :  { %523 = vmatpush3.bf16.msra.mxu0 %v522_v5  ;;  %v531_v13 = vpack.c.bf16 %v176_v10, %v175_v9  ;;  %v86_v16 = vld [vmem:[#allocation2] sm:$0xff]  ;;  %v534_v17 = vpack.c.bf16 %v178_v15, %v177_v14  ;;  %v179_v18 = vld [vmem:[#allocation7 + $0x30] sm:$0xff]  ;;  %v181_v21 = vld [vmem:[#allocation7 + $0x40] sm:$0xff] }
  0x4e   :  { %524 = vmatprep.subr.bf16.mxu0 %v709_v0  ;;  %529 = vmatpush3.bf16.msra.mxu1 %v528_v12  ;;  %v180_v19 = vld [vmem:[#allocation7 + $0x38] sm:$0xff]  ;;  %v182_v22 = vld [vmem:[#allocation7 + $0x48] sm:$0xff]  ;;  %v183_v24 = vld [vmem:[#allocation7 + $0x50] sm:$0xff] }
  0x4f   :  { %530 = vmatprep.subr.bf16.mxu1 %v709_v0  ;;  %v537_v20 = vpack.c.bf16 %v180_v19, %v179_v18  ;;  %v540_v23 = vpack.c.bf16 %v182_v22, %v181_v21  ;;  %v184_v25 = vld [vmem:[#allocation7 + $0x58] sm:$0xff]  ;;  %v185_v27 = vld [vmem:[#allocation7 + $0x60] sm:$0xff]  ;;  %v186_v28 = vld [vmem:[#allocation7 + $0x68] sm:$0xff] }
  0x50   :  { %v543_v26 = vpack.c.bf16 %v184_v25, %v183_v24  ;;  %v546_v29 = vpack.c.bf16 %v186_v28, %v185_v27  ;;  %v187_v30 = vld [vmem:[#allocation7 + $0x70] sm:$0xff]  ;;  %v188_v31 = vld [vmem:[#allocation7 + $0x78] sm:$0xff]  ;;  %v267_v33 = vld [vmem:[#allocation8] sm:$0xff] }
  0x51   :  { %526 = vmatpush3.bf16.msra.mxu0 %v525_v11  ;;  %v549_v32 = vpack.c.bf16 %v188_v31, %v187_v30  ;;  %v268_v34 = vld [vmem:[#allocation8 + $0x8] sm:$0xff]  ;;  %v269_v35 = vld [vmem:[#allocation8 + $0x10] sm:$0xff]  ;;  %v270_v37 = vld [vmem:[#allocation8 + $0x18] sm:$0xff] }
  0x52   :  { %551 = vmatprep.subr.bf16.mxu0 %v709_v0  ;;  %532 = vmatpush3.bf16.msra.mxu1 %v531_v13  ;;  %v552_v36 = vpack.c.bf16 %v268_v34, %v267_v33  ;;  %v555_v38 = vpack.c.bf16 %v270_v37, %v269_v35  ;;  %v271_v39 = vld [vmem:[#allocation8 + $0x20] sm:$0xff]  ;;  %v272_v40 = vld [vmem:[#allocation8 + $0x28] sm:$0xff]  ;;  %v273_v42 = vld [vmem:[#allocation8 + $0x30] sm:$0xff] }
  0x53   :  { %533 = vmatprep.subr.bf16.mxu1 %v709_v0  ;;  %v558_v41 = vpack.c.bf16 %v272_v40, %v271_v39  ;;  %v274_v43 = vld [vmem:[#allocation8 + $0x38] sm:$0xff]  ;;  %v275_v45 = vld [vmem:[#allocation8 + $0x40] sm:$0xff]  ;;  %v276_v46 = vld [vmem:[#allocation8 + $0x48] sm:$0xff] }
  0x54   :  { %449 = vmatmul.mubr.msk.f32.vlgmr.msra.gmra.mrb[0].mxu0 %vm98_vm1, %v86_v16  ;;  %v561_v44 = vpack.c.bf16 %v274_v43, %v273_v42  ;;  %v564_v47 = vpack.c.bf16 %v276_v46, %v275_v45  ;;  %v277_v48 = vld [vmem:[#allocation8 + $0x50] sm:$0xff]  ;;  %v278_v49 = vld [vmem:[#allocation8 + $0x58] sm:$0xff]  ;;  %v279_v51 = vld [vmem:[#allocation8 + $0x60] sm:$0xff] }
  0x55   :  { %518 = vmatprep.mubr.msk.f32.mxu0 %vm710_vm0, %v711_v1  ;;  %553 = vmatpush3.bf16.msra.mxu0 %v552_v36  ;;  %v567_v50 = vpack.c.bf16 %v278_v49, %v277_v48  ;;  %v280_v52 = vld [vmem:[#allocation8 + $0x68] sm:$0xff]  ;;  %v395_v54 = vld [vmem:[%s870_s2] ss:$0 sm:$0xff]  ;;  %v281_v59 = vld [vmem:[#allocation8 + $0x70] sm:$0xff] }
  0x56   :  { %535 = vmatpush3.bf16.msra.mxu1 %v534_v17  ;;  %554 = vmatprep.subr.bf16.mxu0 %v709_v0  ;;  %v570_v53 = vpack.c.bf16 %v280_v52, %v279_v51  ;;  %v282_v60 = vld [vmem:[#allocation8 + $0x78] sm:$0xff] }
  0x57   :  { %536 = vmatprep.subr.bf16.mxu1 %v709_v0  ;;  %v573_v61 = vpack.c.bf16 %v282_v60, %v281_v59  ;;  %v397_v62 = vld [vmem:[%s872_s4] ss:$0 sm:$0xff]  ;;  %s712_s4 = smov [#allocation10]  }
  0x58   :  { %v398_v3 = vld [vmem:[%s874_s6] ss:$0 sm:$0xff]  ;;  %s384_s23 = sshll.u32 %s712_s4, 4  ;;  %s385_s23 = int_to_ptr.vmem [resolvable:$true] %s384_s23 }
  0x59   :  { %556 = vmatpush3.bf16.msra.mxu0 %v555_v38  ;;  %v399_v7 = vld [vmem:[%s875_s7] ss:$0 sm:$0xff]  ;;  %s673_s25 = scalar_lea.vmem %s385_s23, 128  ;;  %p678_p5 = scmp.lt.s32.totalorder %s385_s23, %s385_s23 }
  0x5a   :  { %538 = vmatpush3.bf16.msra.mxu1 %v537_v20  ;;  %557 = vmatprep.subr.bf16.mxu0 %v709_v0  ;;  %v400_v9 = vld [vmem:[%s876_s8] ss:$0 sm:$0xff]  ;;  %p674_p4 = scmp.ne.s32.totalorder %s385_s23, %s673_s25  ;;  %p679_p6 = scmp.lt.s32.totalorder %s673_s25, %s673_s25 }
  0x5b   :  { %539 = vmatprep.subr.bf16.mxu1 %v709_v0 }
  0x5c   :  { %p680_p7 = por %p679_p6, %p678_p5 }
  0x5d   :  { %559 = vmatpush3.bf16.msra.mxu0 %v558_v41 }
  0x5e   :  { %541 = vmatpush3.bf16.msra.mxu1 %v540_v23  ;;  %560 = vmatprep.subr.bf16.mxu0 %v709_v0  ;;  %p681_p8 = pnand %p680_p7, %p674_p4 }
  0x5f   :  { %542 = vmatprep.subr.bf16.mxu1 %v709_v0 }
  0x61   :  { %562 = vmatpush3.bf16.msra.mxu0 %v561_v44 }
  0x62   :  { %544 = vmatpush3.bf16.msra.mxu1 %v543_v26  ;;  %563 = vmatprep.subr.bf16.mxu0 %v709_v0 }
  0x63   :  { %545 = vmatprep.subr.bf16.mxu1 %v709_v0 }
  0x65   :  { %565 = vmatpush3.bf16.msra.mxu0 %v564_v47 }
  0x66   :  { %547 = vmatpush3.bf16.msra.mxu1 %v546_v29  ;;  %566 = vmatprep.subr.bf16.mxu0 %v709_v0 }
  0x67   :  { %548 = vmatprep.subr.bf16.mxu1 %v709_v0 }
  0x69   :  { %568 = vmatpush3.bf16.msra.mxu0 %v567_v50 }
  0x6a   :  { %550 = vmatpush3.bf16.msra.mxu1 %v549_v32  ;;  %569 = vmatprep.subr.bf16.mxu0 %v709_v0 }
  0x6d   :  { %571 = vmatpush3.bf16.msra.mxu0 %v570_v53 }
  0x6e   :  { %572 = vmatprep.subr.bf16.mxu0 %v709_v0 }
  0x71   :  { %574 = vmatpush3.bf16.msra.mxu0 %v573_v61 }
 0x127   :  { %v168_v55 = vpop.f32.mrb[0].mxu0 }
 0x128   :  { %v169_v56 = vadd.f32 %v395_v54, %v168_v55  ;;  %v450_v57 = vpop.f32.mrb[1].mxu0 }
 0x12a   :  { %v172_v58 = vmax.f32 %v169_v56, 0.0 }
 0x12c   :  { %484 = vmatmul.mubr.f32.vlgmr.msra.gmra.mrb[0].mxu1 %v172_v58 }
 0x1ff   :  { %v262_v63 = vpop.f32.mrb[0].mxu1 }
 0x200   :  { %v263_v1 = vadd.f32 %v397_v62, %v262_v63  ;;  %v485_v0 = vpop.f32.mrb[1].mxu1 }
 0x202   :  { %v266_v2 = vmax.f32 %v263_v1, 0.0 }
 0x204   :  { %519 = vmatmul.mubr.f32.vlgmr.msra.gmra.mrb[2].mxu0 %v266_v2 }
 0x2d7   :  { %v356_v4 = vpop.f32.mrb[2].mxu0 }
 0x2d8   :  { %v357_v5 = vadd.f32 %v398_v3, %v356_v4  ;;  %v520_v6 = vpop.f32.mrb[3].mxu0 }
 0x2da   :  { %v360_v8 = vmax.f32 %v357_v5, 0.0 }
 0x2dc   :  { %v368_v10 = vmul.f32 %v399_v7, %v360_v8 }
 0x2de   :  { %v376_v11 = vadd.f32 %v400_v9, %v368_v10 }
 0x2e0   :  { %377 = vst [vmem:[#allocation10] sm:$0xff] %v376_v11 }
 0x2e1   :  { %684 = shalt.err (!%p681_p8)
}
 0x2e2   :  { %s685_s0 = scalar_lea.hbm %s877_s9, 128 }
 0x2e3   :  { %p686_p9 = scmp.ne.s32.totalorder %s877_s9, %s685_s0  ;;  %p689_p10 = scmp.lt.u32.totalorder %s685_s0, %s877_s9 }
 0x2e5   :  { %p691_p11 = pnand %p689_p10, %p686_p9 }
 0x2e7   :  { %694 = shalt.err (!%p691_p11)
}
 0x2e8   :  { %387 = dma.vmem_to_hbm [thread:$0]  %s385_s23, 128, %s877_s9, [#allocation4]  }
 0x2e9   :  { %701 = dma.done.wait [#allocation4], 128  }
 0x2ea   :  { %702 = vsyncadd [#allocation4], 4294967168 }
 0x2eb   :  { %391 = vsyncpa [#allocation3], 1 }
 0x2ec   :  { %392 = vsyncpa [#allocation6], 1 }
 0x2ed   :  { %393 = vsyncpa [#allocation9], 1 }
 0x2ee   :  { %394 = vsyncpa [#allocation4], 1 }

</bundles_post_ra>
